<compile_context>
chip_gen: v7x
topology: tpu7x:2x2x1
jax: 0.10.0
libtpu: 0.0.40
codegen_flags: <defaults>
</compile_context>

<pallas_src>
import jax
import jax.numpy as jnp
from jax.experimental import pallas as pl
from jax.experimental.pallas import tpu as pltpu


def _affine_clip_kernel(x_ref, sb_ref, o_ref):
    # x_ref  : VMEM [block_rows, block_cols]  image tile
    # sb_ref : VMEM [block_rows, 2]           per-row (scale, bias)
    # o_ref  : VMEM [block_rows, block_cols]
    scale = sb_ref[:, 0:1]
    bias = sb_ref[:, 1:2]
    y = x_ref[...] * scale + bias          # lane broadcast of the column (XLU, hidden)
    o_ref[...] = jnp.clip(y, 0.0, 1.0).astype(o_ref.dtype)


def _sublane_multiple(itemsize):
    # Minimum sublane tiling per dtype width (f32 -> 8, bf16 -> 16, int8 -> 32).
    return {4: 8, 2: 16, 1: 32}.get(itemsize, 8)


def _pick_blocks(n_rows, n_cols, itemsize, target_bytes):
    """Pick (block_rows, block_cols): lane block a multiple of 128 (or full
    extent), sublane block a dtype-aware multiple (or full extent), tile size
    ~target_bytes.  Ragged last blocks are fine: pl.cdiv + masked stores."""
    sub = _sublane_multiple(itemsize)
    target_elems = max(sub * 128, target_bytes // max(1, itemsize))

    # Lane (last-dim) block: multiple of 128 that still leaves >= `sub` rows
    # in the tile, or the full extent when the row is small.
    max_block_cols = max(128, (target_elems // sub) // 128 * 128)
    block_cols = n_cols if n_cols <= max_block_cols else max_block_cols

    # Sublane block: fill the remaining budget.
    rows_budget = max(sub, (target_elems // block_cols) // sub * sub)
    block_rows = n_rows if n_rows <= rows_budget else rows_budget
    return block_rows, block_cols


def _apply_fn_pallas(x2, sb, *, target_bytes=2 * 1024 * 1024):
    """clip(scale_row * x2 + bias_row, 0, 1) over a (R, L) array.

    target_bytes ~2 MiB is safe for v5e's 16 MiB scoped-VMEM default; on v7x
    it can be raised to ~4 MiB if profiling shows exposed per-step overhead.
    """
    R, L = x2.shape
    block_rows, block_cols = _pick_blocks(R, L, x2.dtype.itemsize, target_bytes)
    grid = (pl.cdiv(R, block_rows), pl.cdiv(L, block_cols))

    return pl.pallas_call(
        _affine_clip_kernel,
        out_shape=jax.ShapeDtypeStruct((R, L), x2.dtype),
        grid_spec=pl.GridSpec(
            grid=grid,
            in_specs=[
                pl.BlockSpec((block_rows, block_cols), lambda i, j: (i, j)),  # x tile
                pl.BlockSpec((block_rows, 2), lambda i, j: (i, 0)),           # (scale, bias)
            ],
            out_specs=pl.BlockSpec((block_rows, block_cols), lambda i, j: (i, j)),
        ),
        input_output_aliases={0: 0},   # affine branch may write x2 in place
        compiler_params=pltpu.CompilerParams(
            dimension_semantics=("parallel", "parallel")),
    )(x2, sb)


def random_apply(x, scale, bias, p, key, *, use_pallas=None,
                 min_pallas_bytes=256 * 1024):
    """RandomApply(fn, p)(x) with fn = per-channel affine jitter + clip."""
    B, C, H, W = x.shape
    R, L = B * C, H * W

    # Lane/sublane-dense 2D layout: rows = (batch, channel) pairs, lanes = H*W.
    x2 = x.reshape(R, L)

    # Per-row (scale, bias) packed into ONE (R, 2) array (row r -> channel r % C).
    sb = jnp.tile(jnp.stack([scale, bias], axis=-1).astype(x.dtype), (B, 1))

    # PyTorch: `if random.random() > p: return x`  =>  fn applied w.p. p.
    u = jax.random.uniform(key, ())
    apply_flag = u <= p

    if use_pallas is None:
        use_pallas = (R * L * x.dtype.itemsize) >= min_pallas_bytes

    if use_pallas:
        # Branch around the kernel: the identity path does no streaming work
        # (and with input_output_aliases the apply path can write in place).
        out2 = jax.lax.cond(
            apply_flag,
            lambda xx: _apply_fn_pallas(xx, sb),
            lambda xx: xx,
            x2,
        )
    else:
        # Tiny input: one fused XLA elementwise op beats any kernel launch.
        s2 = sb[:, 0:1]
        b2 = sb[:, 1:2]
        out2 = jnp.where(apply_flag, jnp.clip(x2 * s2 + b2, 0.0, 1.0), x2)

    return out2.reshape(B, C, H, W)


if __name__ == "__main__":
    key = jax.random.PRNGKey(0)
    k_x, k_coin = jax.random.split(key)

    # Small NCHW input consistent with an image-transform module.
    B, C, H, W = 2, 4, 16, 16
    x = jax.random.uniform(k_x, (B, C, H, W), dtype=jnp.float32)

    # Deterministic parameters of the wrapped `fn` (per-channel affine jitter).
    scale = 0.8 + 0.05 * jnp.arange(C, dtype=jnp.float32)
    bias = 0.01 * jnp.arange(C, dtype=jnp.float32)

    # Plain-JAX reference of fn(x).
    y_fn = jnp.clip(x * scale.reshape(1, C, 1, 1) + bias.reshape(1, C, 1, 1),
                    0.0, 1.0)

    fn = jax.jit(random_apply, static_argnames=("use_pallas",))

    # 1) Force the apply branch through the Pallas kernel (p = 1.0 => always apply).
    out_apply = jax.block_until_ready(
        fn(x, scale, bias, 1.0, k_coin, use_pallas=True))
    assert jnp.allclose(out_apply, y_fn, atol=1e-6), "apply-branch mismatch"

    # 2) Force the identity branch (p = -1.0 => never apply).
    out_id = jax.block_until_ready(
        fn(x, scale, bias, -1.0, k_coin, use_pallas=True))
    assert jnp.allclose(out_id, x), "identity-branch mismatch"

    # 3) Default auto path with the stochastic coin (tiny input -> fused jnp path).
    p = 0.5
    out = jax.block_until_ready(fn(x, scale, bias, p, k_coin))
    u = jax.random.uniform(k_coin, ())
    ref = jnp.where(u <= p, y_fn, x)
    assert jnp.allclose(out, ref, atol=1e-6), "stochastic-path mismatch"

    print("KERNEL_OK")
</pallas_src>

<mosaic_0001>
module attributes {stable_mosaic.version = 11 : i64} {
  func.func @_affine_clip_kernel(%arg0: i32, %arg1: i32, %arg2: memref<8x256xf32, #tpu.memory_space<vmem>>, %arg3: memref<8x2xf32, #tpu.memory_space<vmem>>, %arg4: memref<8x256xf32, #tpu.memory_space<vmem>>) attributes {dimension_semantics = [#tpu.dimension_semantics<parallel>, #tpu.dimension_semantics<parallel>], iteration_bounds = array<i64: 1, 1>, scalar_prefetch = 0 : i64, scratch_operands = 0 : i64, tpu.core_type = #tpu.core_type<tc>, window_params = [{transform_indices = @transform_0, window_bounds = array<i64: 8, 256>}, {transform_indices = @transform_1, window_bounds = array<i64: 8, 2>}, {transform_indices = @transform_2, window_bounds = array<i64: 8, 256>}]} {
    %c0 = arith.constant 0 : index
    %c0_0 = arith.constant 0 : index
    %0 = vector.load %arg3[%c0, %c0_0] : memref<8x2xf32, #tpu.memory_space<vmem>>, vector<8x1xf32>
    %c0_1 = arith.constant 0 : index
    %c1 = arith.constant 1 : index
    %1 = vector.load %arg3[%c0_1, %c1] : memref<8x2xf32, #tpu.memory_space<vmem>>, vector<8x1xf32>
    %c0_2 = arith.constant 0 : index
    %c0_3 = arith.constant 0 : index
    %2 = vector.load %arg2[%c0_2, %c0_3] : memref<8x256xf32, #tpu.memory_space<vmem>>, vector<8x256xf32>
    %3 = vector.broadcast %0 : vector<8x1xf32> to vector<8x256xf32>
    %4 = arith.mulf %2, %3 : vector<8x256xf32>
    %5 = vector.broadcast %1 : vector<8x1xf32> to vector<8x256xf32>
    %6 = arith.addf %4, %5 : vector<8x256xf32>
    %cst = arith.constant 0.000000e+00 : f32
    %cst_4 = arith.constant 1.000000e+00 : f32
    %7 = vector.broadcast %cst : f32 to vector<8x256xf32>
    %8 = arith.maximumf %7, %6 : vector<8x256xf32>
    %9 = vector.broadcast %cst_4 : f32 to vector<8x256xf32>
    %10 = arith.minimumf %9, %8 : vector<8x256xf32>
    %c0_5 = arith.constant 0 : index
    %c0_6 = arith.constant 0 : index
    %11 = vector.load %arg4[%c0_5, %c0_6] : memref<8x256xf32, #tpu.memory_space<vmem>>, vector<8x256xf32>
    tpu.vector_store %arg4[%c0_5, %c0_6], %10 {strides = array<i32>} : memref<8x256xf32, #tpu.memory_space<vmem>>, vector<8x256xf32>,
    return
  }
  func.func @transform_0(%arg0: i32, %arg1: i32) -> (i32, i32) {
    %c0_i32 = arith.constant 0 : i32
    return %arg0, %arg1 : i32, i32
  }
  func.func @transform_1(%arg0: i32, %arg1: i32) -> (i32, i32) {
    %c0_i32 = arith.constant 0 : i32
    %c0_i32_0 = arith.constant 0 : i32
    return %arg0, %c0_i32 : i32, i32
  }
  func.func @transform_2(%arg0: i32, %arg1: i32) -> (i32, i32) {
    %c0_i32 = arith.constant 0 : i32
    return %arg0, %arg1 : i32, i32
  }
}

</mosaic_0001>

<bundles_post_ra>
// kernel: branch_1_fun.1
= control target key start
LH: loop header
LB: loop body
LE: loop exit
PB: predicated region body
PF: predicated region fallthrough
CT: control target
= control target key end

     0   :  { %v41_v0 = vmov 0   ;;  %v42_v2 = vmov 1   ;;  %s73_s1 = inlined_call_operand.vmem [shape: f32[8,2], index: 1, kind: input, shape index: {}]   ;;  %s74_s0 = inlined_call_operand.vmem [shape: f32[8,256], index: 0, kind: input, shape index: {}, may-alias: {0,2}]   ;;  %s75_s2 = inlined_call_operand.vmem [shape: f32[8,256], index: 2, kind: output, shape index: {}, may-alias: {0,2}]  }
   0x1   :  { %39 = vset.pattern.permute.xlu0 %v41_v0  ;;  %v11_v1 = vld [vmem:[%s73_s1] sm:$0xff]  ;;  %v13_v5 = vld [vmem:[%s74_s0 + $0x8] sm:$0xff] }
   0x2   :  { %16 = vperm.xlu0 %39, %v11_v1   ;;  %v12_v4 = vld [vmem:[%s74_s0] sm:$0xff] }
   0x6   :  { %40 = vset.pattern.permute.xlu0 %v42_v2 }
   0x7   :  { %22 = vperm.xlu0 %40, %v11_v1  }
  0x81   :  { %v17_v3 = vpop.permute.xlu0 %16 }
  0x82   :  { %v19_v6 = vmul.f32 %v17_v3, %v12_v4  ;;  %v20_v7 = vmul.f32 %v17_v3, %v13_v5 }
  0x86   :  { %v23_v8 = vpop.permute.xlu0 %22 }
  0x87   :  { %v25_v9 = vadd.f32 %v23_v8, %v19_v6  ;;  %v26_v10 = vadd.f32 %v23_v8, %v20_v7 }
  0x89   :  { %v27_v11 = vmax.f32 %v25_v9, 0.0  ;;  %v28_v12 = vmax.f32 %v26_v10, 0.0 }
  0x8b   :  { %v29_v13 = vmin.f32 %v27_v11, 1.0  ;;  %v30_v14 = vmin.f32 %v28_v12, 1.0 }
  0x8d   :  { %31 = vst [vmem:[%s75_s2] sm:$0xff] %v29_v13  ;;  %32 = vst [vmem:[%s75_s2 + $0x8] sm:$0xff] %v30_v14 }

</bundles_post_ra>
